<compile_context>
chip_gen: v7x
topology: tpu7x:2x2x1
jax: 0.10.0
libtpu: 0.0.40
codegen_flags: <defaults>
</compile_context>

<pallas_src>
import jax
import jax.numpy as jnp
from jax import lax
from jax.experimental import pallas as pl
from jax.experimental.pallas import tpu as pltpu

LOG_STD_MIN = -10.0
LOG_STD_MAX = 2.0


def _round_up(x, m):
    return ((x + m - 1) // m) * m


def _mish(v):
    """mish(x) = clamp(x * tanh(softplus(x)), max=6); torch softplus threshold=20.

    Single-exp formulation: tanh(softplus(x)) = ((1+e^x)^2 - 1)/((1+e^x)^2 + 1).
    pl.reciprocal(approx=True) keeps this at one full-rate EUP op per element.
    """
    vc = jnp.minimum(v, 20.0)                     # exp(20)^2 ~ 2.4e17, no overflow
    t = 1.0 + jnp.exp(vc)
    s = t * t
    tsp = (s - 1.0) * pl.reciprocal(s + 1.0, approx=True)
    # torch: for x > threshold(20), softplus(x) = x and tanh(x) == 1.0 in f32.
    y = jnp.where(v > 20.0, v, v * tsp)
    return jnp.minimum(y, 6.0)


def make_policy_kernel(num_actions):
    def policy_kernel(x_ref, w1_ref, b1_ref, w2_ref, b2_ref, wh_ref, bh_ref, out_ref):
        x = x_ref[...]                                            # already bf16
        h1 = _mish(jnp.dot(x, w1_ref[...], preferred_element_type=jnp.float32)
                   + b1_ref[...])
        h2 = _mish(jnp.dot(h1.astype(jnp.bfloat16), w2_ref[...],
                           preferred_element_type=jnp.float32) + b2_ref[...])
        out = (jnp.dot(h2.astype(jnp.bfloat16), wh_ref[...],
                       preferred_element_type=jnp.float32) + bh_ref[...])
        # Clip only lanes >= A (log_std half + zero padding) — pure VPU.
        lane = lax.broadcasted_iota(jnp.int32, out.shape, 1)
        clipped = jnp.clip(out, LOG_STD_MIN, LOG_STD_MAX)
        out_ref[...] = jnp.where(lane >= num_actions, clipped, out)

    return policy_kernel


def policy_forward(state, packed, *, batch_tile=512, gridless_max_batch=512):
    """Returns (mean, log_std), matching PolicyNetwork.forward semantics."""
    w1, b1, w2, b2, wh, bh = (packed["w1"], packed["b1"], packed["w2"],
                              packed["b2"], packed["wh"], packed["bh"])
    A = packed["num_actions"]
    B, n_in = state.shape
    H = w1.shape[1]
    lanes = wh.shape[1]                                           # 128-multiple
    kernel = make_policy_kernel(A)
    vmem = pltpu.MemorySpace.VMEM

    # Feed x as bf16: halves the streamed-input DMA bytes; MXU accumulates f32.
    x = state.astype(jnp.bfloat16)

    weight_bytes = ((w1.size + w2.size + wh.size) * 2
                    + (b1.size + b2.size + bh.size) * 4)

    def _vmem_limit(act_bytes):
        return int(min(128 * 1024 * 1024,
                       max(16 * 1024 * 1024,
                           weight_bytes + act_bytes + 4 * 1024 * 1024)))

    if B <= gridless_max_batch:
        # Small/medium batch: gridless call, whole arrays as single VMEM blocks.
        # Best on single-TC v5e/v6e: no pipeline scaffolding, no per-step cost.
        PB = max(8, _round_up(B, 8))
        xp = x if PB == B else jnp.pad(x, ((0, PB - B), (0, 0)))
        act_bytes = PB * (n_in * 2 + 2 * H * 4 + lanes * 4)
        out = pl.pallas_call(
            kernel,
            out_shape=jax.ShapeDtypeStruct((PB, lanes), jnp.float32),
            in_specs=[pl.BlockSpec(memory_space=vmem)] * 7,
            out_specs=pl.BlockSpec(memory_space=vmem),
            compiler_params=pltpu.CompilerParams(
                vmem_limit_bytes=_vmem_limit(act_bytes)),
        )(xp, w1, b1, w2, b2, wh, bh)
    else:
        # Large batch: tile the batch axis, mark it "parallel" (v7x megacore).
        # Keep >= 2 tiles so both TensorCores get work on v7x.
        tile = min(batch_tile, max(16, _round_up(pl.cdiv(B, 2), 16)))
        PB = _round_up(B, tile)
        xp = x if PB == B else jnp.pad(x, ((0, PB - B), (0, 0)))
        act_bytes = 2 * tile * (n_in * 2 + lanes * 4) + tile * 2 * H * 4
        vmem_limit = _vmem_limit(act_bytes)

        def _call(single_buffer_weights):
            def resident(arr):
                # Weights/biases never change across grid steps; single-buffer
                # them so they don't cost 2x VMEM.
                if single_buffer_weights:
                    return pl.BlockSpec(arr.shape, lambda i: (0,) * arr.ndim,
                                        pipeline_mode=pl.Buffered(1))
                return pl.BlockSpec(arr.shape, lambda i: (0,) * arr.ndim)

            return pl.pallas_call(
                kernel,
                out_shape=jax.ShapeDtypeStruct((PB, lanes), jnp.float32),
                grid=(PB // tile,),
                in_specs=[pl.BlockSpec((tile, n_in), lambda i: (i, 0)),
                          resident(w1), resident(b1), resident(w2), resident(b2),
                          resident(wh), resident(bh)],
                out_specs=pl.BlockSpec((tile, lanes), lambda i: (i, 0)),
                compiler_params=pltpu.CompilerParams(
                    dimension_semantics=("parallel",),
                    vmem_limit_bytes=vmem_limit),
            )(xp, w1, b1, w2, b2, wh, bh)

        try:
            out = _call(True)
        except Exception:
            # Fallback for jax versions without pipeline_mode / Buffered(1).
            out = _call(False)
        # NOTE: for very large hidden_size, additionally tile the hidden (K)
        # dim with an "arbitrary" reduction axis instead of whole-weight blocks.

    out = out[:B]
    return out[:, :A], out[:, A:2 * A]


def init_params(key, num_inputs, num_actions, hidden_size, init_w=0.003):
    """Uniform(-init_w, init_w) init, mirroring the PyTorch __init__ (f32)."""
    ks = jax.random.split(key, 8)

    def u(k, shape):
        return jax.random.uniform(k, shape, jnp.float32, -init_w, init_w)

    w1 = u(ks[0], (num_inputs, hidden_size))
    b1 = u(ks[1], (1, hidden_size))
    w2 = u(ks[2], (hidden_size, hidden_size))
    b2 = u(ks[3], (1, hidden_size))
    wm = u(ks[4], (hidden_size, num_actions))
    bm = u(ks[5], (1, num_actions))
    ws = u(ks[6], (hidden_size, num_actions))
    bs = u(ks[7], (1, num_actions))
    return (w1, b1, w2, b2, wm, bm, ws, bs)


def pack_params(params):
    """Fuse the two heads, zero-pad to a 128-lane multiple, cast weights to bf16."""
    w1, b1, w2, b2, wm, bm, ws, bs = params
    num_actions = wm.shape[1]
    two_a = 2 * num_actions
    lanes = max(128, _round_up(two_a, 128))
    wh = jnp.pad(jnp.concatenate([wm, ws], axis=1), ((0, 0), (0, lanes - two_a)))
    bh = jnp.pad(jnp.concatenate([bm, bs], axis=1), ((0, 0), (0, lanes - two_a)))
    return dict(
        w1=w1.astype(jnp.bfloat16), b1=b1,
        w2=w2.astype(jnp.bfloat16), b2=b2,
        wh=wh.astype(jnp.bfloat16), bh=bh,
        num_actions=num_actions,
    )


# ---------------- reference (torch-style mish, f32 math) ----------------

def _ref_mish(v):
    # torch: clamp(x * tanh(F.softplus(x)), max=6); softplus threshold = 20
    sp = jnp.where(v > 20.0, v, jnp.log1p(jnp.exp(jnp.minimum(v, 20.0))))
    return jnp.minimum(v * jnp.tanh(sp), 6.0)


def _reference_forward(state, packed):
    """f32 reference using the same bf16-rounded weights/inputs (cast back to f32)."""
    f = lambda a: a.astype(jnp.float32)
    x = f(state.astype(jnp.bfloat16))
    h1 = _ref_mish(x @ f(packed["w1"]) + packed["b1"])
    h2 = _ref_mish(h1 @ f(packed["w2"]) + packed["b2"])
    out = h2 @ f(packed["wh"]) + packed["bh"]
    A = packed["num_actions"]
    mean = out[:, :A]
    log_std = jnp.clip(out[:, A:2 * A], LOG_STD_MIN, LOG_STD_MAX)
    return mean, log_std


if __name__ == "__main__":
    key = jax.random.PRNGKey(0)
    k_state, k_params, k_mid, k_big = jax.random.split(key, 4)

    batch = 2
    num_inputs = 16
    num_actions = 4
    hidden_size = 32

    packed = pack_params(init_params(k_params, num_inputs, num_actions, hidden_size))

    def check(s, **kw):
        mean, log_std = policy_forward(s, packed, **kw)
        jax.block_until_ready((mean, log_std))
        ref_mean, ref_log_std = _reference_forward(s, packed)
        assert mean.shape == (s.shape[0], num_actions)
        assert log_std.shape == (s.shape[0], num_actions)
        assert jnp.allclose(mean, ref_mean, atol=1e-4, rtol=1e-2)
        assert jnp.allclose(log_std, ref_log_std, atol=1e-4, rtol=1e-2)

    # small batch -> gridless whole-VMEM path
    state = jax.random.normal(k_state, (batch, num_inputs), jnp.float32)
    check(state)

    # mid batch (300) -> still gridless (single-TC friendly threshold = 512)
    mid_state = jax.random.normal(k_mid, (300, num_inputs), jnp.float32)
    check(mid_state)

    # same mid batch, forced onto the grid path -> exercises >=2-tile guard
    check(mid_state, gridless_max_batch=0)

    # large batch (600) -> batch-tiled "parallel" grid path
    big_state = jax.random.normal(k_big, (600, num_inputs), jnp.float32)
    check(big_state)

    print("KERNEL_OK")
</pallas_src>

<mosaic_0001>
module attributes {stable_mosaic.version = 11 : i64} {
  func.func @policy_kernel(%arg0: memref<8x16xbf16, #tpu.memory_space<vmem>>, %arg1: memref<16x32xbf16, #tpu.memory_space<vmem>>, %arg2: memref<1x32xf32, #tpu.memory_space<vmem>>, %arg3: memref<32x32xbf16, #tpu.memory_space<vmem>>, %arg4: memref<1x32xf32, #tpu.memory_space<vmem>>, %arg5: memref<32x128xbf16, #tpu.memory_space<vmem>>, %arg6: memref<1x128xf32, #tpu.memory_space<vmem>>, %arg7: memref<8x128xf32, #tpu.memory_space<vmem>>) attributes {dimension_semantics = [], scalar_prefetch = 0 : i64, scratch_operands = 0 : i64, tpu.core_type = #tpu.core_type<tc>} {
    %c0 = arith.constant 0 : index
    %c0_0 = arith.constant 0 : index
    %0 = vector.load %arg0[%c0, %c0_0] : memref<8x16xbf16, #tpu.memory_space<vmem>>, vector<8x16xbf16>
    %c0_1 = arith.constant 0 : index
    %c0_2 = arith.constant 0 : index
    %1 = vector.load %arg1[%c0_1, %c0_2] : memref<16x32xbf16, #tpu.memory_space<vmem>>, vector<16x32xbf16>
    %cst = arith.constant dense<0.000000e+00> : vector<8x32xf32>
    %2 = tpu.matmul %0, %1, %cst {dimension_numbers = #tpu.dot_dimension_numbers<[1], [0], [0], [1], [0, 0, 1, 1], [], []>} : vector<8x16xbf16>, vector<16x32xbf16>, vector<8x32xf32> -> vector<8x32xf32>
    %c0_3 = arith.constant 0 : index
    %c0_4 = arith.constant 0 : index
    %3 = vector.load %arg2[%c0_3, %c0_4] : memref<1x32xf32, #tpu.memory_space<vmem>>, vector<1x32xf32>
    %4 = vector.broadcast %3 : vector<1x32xf32> to vector<8x32xf32>
    %5 = arith.addf %2, %4 : vector<8x32xf32>
    %cst_5 = arith.constant 2.000000e+01 : f32
    %6 = vector.broadcast %cst_5 : f32 to vector<8x32xf32>
    %7 = arith.minimumf %5, %6 : vector<8x32xf32>
    %8 = math.exp %7 : vector<8x32xf32>
    %cst_6 = arith.constant 1.000000e+00 : f32
    %9 = vector.broadcast %cst_6 : f32 to vector<8x32xf32>
    %10 = arith.addf %9, %8 : vector<8x32xf32>
    %11 = arith.mulf %10, %10 : vector<8x32xf32>
    %cst_7 = arith.constant 1.000000e+00 : f32
    %12 = vector.broadcast %cst_7 : f32 to vector<8x32xf32>
    %13 = arith.subf %11, %12 : vector<8x32xf32>
    %cst_8 = arith.constant 1.000000e+00 : f32
    %14 = vector.broadcast %cst_8 : f32 to vector<8x32xf32>
    %15 = arith.addf %11, %14 : vector<8x32xf32>
    %16 = tpu.reciprocal %15 {approx = true} : vector<8x32xf32> -> vector<8x32xf32>
    %17 = arith.mulf %13, %16 : vector<8x32xf32>
    %cst_9 = arith.constant 2.000000e+01 : f32
    %18 = vector.broadcast %cst_9 : f32 to vector<8x32xf32>
    %19 = arith.cmpf ogt, %5, %18 : vector<8x32xf32>
    %20 = arith.mulf %5, %17 : vector<8x32xf32>
    %21 = arith.select %19, %5, %20 : vector<8x32xi1>, vector<8x32xf32>
    %cst_10 = arith.constant 6.000000e+00 : f32
    %22 = vector.broadcast %cst_10 : f32 to vector<8x32xf32>
    %23 = arith.minimumf %21, %22 : vector<8x32xf32>
    %24 = arith.truncf %23 : vector<8x32xf32> to vector<8x32xbf16>
    %c0_11 = arith.constant 0 : index
    %c0_12 = arith.constant 0 : index
    %25 = vector.load %arg3[%c0_11, %c0_12] : memref<32x32xbf16, #tpu.memory_space<vmem>>, vector<32x32xbf16>
    %cst_13 = arith.constant dense<0.000000e+00> : vector<8x32xf32>
    %26 = tpu.matmul %24, %25, %cst_13 {dimension_numbers = #tpu.dot_dimension_numbers<[1], [0], [0], [1], [0, 0, 1, 1], [], []>} : vector<8x32xbf16>, vector<32x32xbf16>, vector<8x32xf32> -> vector<8x32xf32>
    %c0_14 = arith.constant 0 : index
    %c0_15 = arith.constant 0 : index
    %27 = vector.load %arg4[%c0_14, %c0_15] : memref<1x32xf32, #tpu.memory_space<vmem>>, vector<1x32xf32>
    %28 = vector.broadcast %27 : vector<1x32xf32> to vector<8x32xf32>
    %29 = arith.addf %26, %28 : vector<8x32xf32>
    %cst_16 = arith.constant 2.000000e+01 : f32
    %30 = vector.broadcast %cst_16 : f32 to vector<8x32xf32>
    %31 = arith.minimumf %29, %30 : vector<8x32xf32>
    %32 = math.exp %31 : vector<8x32xf32>
    %cst_17 = arith.constant 1.000000e+00 : f32
    %33 = vector.broadcast %cst_17 : f32 to vector<8x32xf32>
    %34 = arith.addf %33, %32 : vector<8x32xf32>
    %35 = arith.mulf %34, %34 : vector<8x32xf32>
    %cst_18 = arith.constant 1.000000e+00 : f32
    %36 = vector.broadcast %cst_18 : f32 to vector<8x32xf32>
    %37 = arith.subf %35, %36 : vector<8x32xf32>
    %cst_19 = arith.constant 1.000000e+00 : f32
    %38 = vector.broadcast %cst_19 : f32 to vector<8x32xf32>
    %39 = arith.addf %35, %38 : vector<8x32xf32>
    %40 = tpu.reciprocal %39 {approx = true} : vector<8x32xf32> -> vector<8x32xf32>
    %41 = arith.mulf %37, %40 : vector<8x32xf32>
    %cst_20 = arith.constant 2.000000e+01 : f32
    %42 = vector.broadcast %cst_20 : f32 to vector<8x32xf32>
    %43 = arith.cmpf ogt, %29, %42 : vector<8x32xf32>
    %44 = arith.mulf %29, %41 : vector<8x32xf32>
    %45 = arith.select %43, %29, %44 : vector<8x32xi1>, vector<8x32xf32>
    %cst_21 = arith.constant 6.000000e+00 : f32
    %46 = vector.broadcast %cst_21 : f32 to vector<8x32xf32>
    %47 = arith.minimumf %45, %46 : vector<8x32xf32>
    %48 = arith.truncf %47 : vector<8x32xf32> to vector<8x32xbf16>
    %c0_22 = arith.constant 0 : index
    %c0_23 = arith.constant 0 : index
    %49 = vector.load %arg5[%c0_22, %c0_23] : memref<32x128xbf16, #tpu.memory_space<vmem>>, vector<32x128xbf16>
    %cst_24 = arith.constant dense<0.000000e+00> : vector<8x128xf32>
    %50 = tpu.matmul %48, %49, %cst_24 {dimension_numbers = #tpu.dot_dimension_numbers<[1], [0], [0], [1], [0, 0, 1, 1], [], []>} : vector<8x32xbf16>, vector<32x128xbf16>, vector<8x128xf32> -> vector<8x128xf32>
    %c0_25 = arith.constant 0 : index
    %c0_26 = arith.constant 0 : index
    %51 = vector.load %arg6[%c0_25, %c0_26] : memref<1x128xf32, #tpu.memory_space<vmem>>, vector<1x128xf32>
    %52 = vector.broadcast %51 : vector<1x128xf32> to vector<8x128xf32>
    %53 = arith.addf %50, %52 : vector<8x128xf32>
    %54 = tpu.iota {dimensions = array<i32: 1>} : vector<8x128xi32>
    %cst_27 = arith.constant -1.000000e+01 : f32
    %cst_28 = arith.constant 2.000000e+00 : f32
    %55 = vector.broadcast %cst_27 : f32 to vector<8x128xf32>
    %56 = arith.maximumf %55, %53 : vector<8x128xf32>
    %57 = vector.broadcast %cst_28 : f32 to vector<8x128xf32>
    %58 = arith.minimumf %57, %56 : vector<8x128xf32>
    %c4_i32 = arith.constant 4 : i32
    %59 = vector.broadcast %c4_i32 : i32 to vector<8x128xi32>
    %60 = arith.cmpi sge, %54, %59 : vector<8x128xi32>
    %61 = arith.select %60, %58, %53 : vector<8x128xi1>, vector<8x128xf32>
    %c0_29 = arith.constant 0 : index
    %c0_30 = arith.constant 0 : index
    %62 = vector.load %arg7[%c0_29, %c0_30] : memref<8x128xf32, #tpu.memory_space<vmem>>, vector<8x128xf32>
    tpu.vector_store %arg7[%c0_29, %c0_30], %61 {strides = array<i32>} : memref<8x128xf32, #tpu.memory_space<vmem>>, vector<8x128xf32>,
    return
  }
}

</mosaic_0001>

<bundles_post_ra>
// kernel: tpu_custom_call.1
= control target key start
LH: loop header
LB: loop body
LE: loop exit
PB: predicated region body
PF: predicated region fallthrough
CT: control target
= control target key end

     0   :  { %12 = vsyncpa [#allocation3], 0  ;;  %s588_s0 = inlined_call_operand.hbm [shape: bf16[8,16], index: 0, kind: input, shape index: {}]   ;;  %s589_s1 = inlined_call_operand.hbm [shape: bf16[16,32], index: 1, kind: input, shape index: {}]   ;;  %s590_s2 = inlined_call_operand.vmem [shape: f32[1,32], index: 2, kind: input, shape index: {}]   ;;  %s591_s3 = inlined_call_operand.hbm [shape: bf16[32,32], index: 3, kind: input, shape index: {}]   ;;  %s592_s4 = inlined_call_operand.vmem [shape: f32[1,32], index: 4, kind: input, shape index: {}]   ;;  %s593_s5 = inlined_call_operand.vmem [shape: bf16[32,128], index: 5, kind: input, shape index: {}]   ;;  %s594_s6 = inlined_call_operand.vmem [shape: f32[1,128], index: 6, kind: input, shape index: {}]   ;;  %s595_s7 = inlined_call_operand.hbm [shape: f32[8,128], index: 7, kind: output, shape index: {}]  }
   0x1   :  { %13 = vsyncpa [#allocation6], 0 }
   0x2   :  { %14 = vsyncpa [#allocation4], 0  ;;  %s469_s24 = smov [#allocation5]   ;;  %s375_s28 = scalar_lea.hbm %s589_s1, 128 }
   0x3   :  { %s30_s25 = sshll.u32 %s469_s24, 4  ;;  %p376_p0 = scmp.ne.s32.totalorder %s589_s1, %s375_s28  ;;  %s31_s25 = int_to_ptr.vmem [resolvable:$true] %s30_s25 }
   0x4   :  { %p379_p1 = scmp.lt.u32.totalorder %s375_s28, %s589_s1 }
   0x6   :  { %p381_p2 = pnand %p379_p1, %p376_p0 }
   0x8   :  { %384 = shalt.err (!%p381_p2)
}
   0x9   :  { %s385_s10 = scalar_lea.vmem %s31_s25, 128  ;;  %p390_p4 = scmp.lt.s32.totalorder %s31_s25, %s31_s25 }
   0xa   :  { %p386_p3 = scmp.ne.s32.totalorder %s31_s25, %s385_s10  ;;  %p391_p5 = scmp.lt.s32.totalorder %s385_s10, %s385_s10 }
   0xc   :  { %p392_p6 = por %p391_p5, %p390_p4 }
   0xe   :  { %p393_p7 = pnand %p392_p6, %p386_p3 }
  0x10   :  { %396 = shalt.err (!%p393_p7)
}
  0x11   :  { %s470_s11 = smov 64   ;;  %s471_s12 = smov 4  }
  0x12   :  { %36 = dma.hbm_to_vmem [thread:$0]  %s589_s1, 128, %s31_s25, [#allocation6], %s470_s11, %s470_s11, %s471_s12  }
  0x13   :  { %s472_s15 = smov [#allocation2]   ;;  %s473_s17 = smov [#allocation7]  }
  0x14   :  { %s21_s16 = sshll.u32 %s472_s15, 4  ;;  %s44_s18 = sshll.u32 %s473_s17, 4  ;;  %s22_s16 = int_to_ptr.vmem [resolvable:$true] %s21_s16  ;;  %s45_s18 = int_to_ptr.vmem [resolvable:$true] %s44_s18 }
  0x15   :  { %s397_s21 = scalar_lea.hbm %s588_s0, 64 }
  0x16   :  { %p398_p8 = scmp.ne.s32.totalorder %s588_s0, %s397_s21  ;;  %p401_p9 = scmp.lt.u32.totalorder %s397_s21, %s588_s0 }
  0x18   :  { %p403_p10 = pnand %p401_p9, %p398_p8 }
  0x1a   :  { %406 = shalt.err (!%p403_p10)
}
  0x1b   :  { %s407_s1 = scalar_lea.vmem %s22_s16, 64  ;;  %p412_p12 = scmp.lt.s32.totalorder %s22_s16, %s22_s16 }
  0x1c   :  { %p408_p11 = scmp.ne.s32.totalorder %s22_s16, %s407_s1  ;;  %p413_p13 = scmp.lt.s32.totalorder %s407_s1, %s407_s1 }
  0x1e   :  { %p414_p0 = por %p413_p13, %p412_p12 }
  0x20   :  { %p415_p1 = pnand %p414_p0, %p408_p11 }
  0x22   :  { %418 = shalt.err (!%p415_p1)
}
  0x23   :  { %24 = dma.hbm_to_vmem [thread:$0]  %s588_s0, 64, %s22_s16, [#allocation3]  }
  0x24   :  { %s419_s30 = scalar_lea.hbm %s591_s3, 256 }
  0x25   :  { %p420_p2 = scmp.ne.s32.totalorder %s591_s3, %s419_s30  ;;  %p423_p3 = scmp.lt.u32.totalorder %s419_s30, %s591_s3 }
  0x27   :  { %p425_p4 = pnand %p423_p3, %p420_p2 }
  0x29   :  { %428 = shalt.err (!%p425_p4)
}
  0x2a   :  { %s429_s14 = scalar_lea.vmem %s45_s18, 256  ;;  %p434_p6 = scmp.lt.s32.totalorder %s45_s18, %s45_s18 }
  0x2b   :  { %p430_p5 = scmp.ne.s32.totalorder %s45_s18, %s429_s14  ;;  %p435_p7 = scmp.lt.s32.totalorder %s429_s14, %s429_s14 }
  0x2d   :  { %p436_p8 = por %p435_p7, %p434_p6 }
  0x2f   :  { %p437_p9 = pnand %p436_p8, %p430_p5 }
  0x31   :  { %440 = shalt.err (!%p437_p9)
}
  0x32   :  { %50 = dma.hbm_to_vmem [thread:$0]  %s591_s3, 256, %s45_s18, [#allocation6], %s470_s11, %s470_s11, %s471_s12  }
  0x33   :  { %463 = dma.done.wait [#allocation3], 64  }
  0x34   :  { %464 = vsyncadd [#allocation3], 4294967232 }
  0x35   :  { %465 = dma.done.wait [#allocation6], 384  }
  0x36   :  { %466 = vsyncadd [#allocation6], 4294966912  ;;  %v474_v0 = vmov 0.0   ;;  %vm475_vm0 = vmmov 0   ;;  %v362_v1 = vld [vmem:[#allocation5] sm:$0xff]   ;;  %vm83_vm1 = vcmask 130048   ;;  %v288_v45 = vlaneseq }
  0x37   :  { %332 = vmatprep.subr.bf16.mxu0 %v474_v0  ;;  %334 = vmatprep.mubr.msk.bf16.mxu0 %vm475_vm0, %v474_v0  ;;  %v67_v2 = vld [vmem:[#allocation2] sm:$0xf]  ;;  %v363_v3 = vld [vmem:[#allocation7] sm:$0xff]   ;;  %v364_v4 = vld [vmem:[#allocation7 + $0x8] sm:$0xff]   ;;  %vm164_vm3 = vcmask 261120   ;;  %s476_s20 = smov [#allocation8]  }
  0x38   :  { %338 = vmatprep.subr.bf16.mxu1 %v474_v0  ;;  %342 = vmatprep.mubr.msk.bf16.mxu1 %vm475_vm0, %v474_v0  ;;  %v311_v5 = vld [vmem:[%s590_s2] ss:$0 sm:$0xff]  ;;  %v366_v25 = vld [vmem:[%s593_s5 + $0x8] sm:$0xff]   ;;  %v289_v48 = vand.u32 127, %v288_v45  ;;  %s301_s21 = sshll.u32 %s476_s20, 4  ;;  %s302_s21 = int_to_ptr.vmem [resolvable:$true] %s301_s21 }
  0x39   :  { %333 = vmatpush3.bf16.msra.mxu0 %v362_v1  ;;  %339 = vmatpush3.bf16.msra.mxu1 %v363_v3  ;;  %v365_v24 = vld [vmem:[%s593_s5] sm:$0xff]   ;;  %s441_s22 = scalar_lea.vmem %s302_s21, 128  ;;  %p446_p11 = scmp.lt.s32.totalorder %s302_s21, %s302_s21 }
  0x3a   :  { %346 = vmatprep.subr.bf16.mxu0 %v474_v0  ;;  %340 = vmatprep.subr.bf16.mxu1 %v474_v0  ;;  %v315_v26 = vld [vmem:[%s592_s4] ss:$0 sm:$0xff]  ;;  %vm292_vm5 = vcmp.ge.s32.totalorder %v289_v48, 4  ;;  %p442_p10 = scmp.ne.s32.totalorder %s302_s21, %s441_s22  ;;  %p447_p12 = scmp.lt.s32.totalorder %s441_s22, %s441_s22 }
  0x3b   :  { %v320_v46 = vld [vmem:[%s594_s6] ss:$0 sm:$0xff] }
  0x3c   :  { %335 = vmatmul.mubr.msk.bf16.vlgmr.msra.gmra.mrb[0].mxu0 %vm83_vm1, %v67_v2  ;;  %p448_p13 = por %p447_p12, %p446_p11 }
  0x3d   :  { %350 = vmatprep.mubr.msk.bf16.mxu0 %vm475_vm0, %v474_v0  ;;  %341 = vmatpush3.bf16.msra.mxu1 %v364_v4 }
  0x3e   :  { %347 = vmatpush3.bf16.msra.mxu0 %v365_v24  ;;  %p449_p0 = pnand %p448_p13, %p442_p10 }
  0x3f   :  { %348 = vmatprep.subr.bf16.mxu0 %v474_v0 }
  0x42   :  { %349 = vmatpush3.bf16.msra.mxu0 %v366_v25 }
 0x10f   :  { %v121_v6 = vpop.f32.mrb[0].mxu0 }
 0x110   :  { %v122_v7 = vadd.f32 %v311_v5, %v121_v6  ;;  %v336_v8 = vpop.f32.mrb[1].mxu0 }
 0x111   :  { %v124_v9 = vpop.f32.mrb[2].mxu0 }
 0x112   :  { %v127_v10 = vmin.f32 %v122_v7, 20.0  ;;  %v337_v11 = vpop.f32.mrb[3].mxu0  ;;  %vm136_vm2 = vcmp.gt.f32.partialorder %v122_v7, 20.0 }
 0x114   :  { %v128_v12 = vmul.f32 1.442695, %v127_v10 }
 0x116   :  { %367 = vpow2.f32 %v128_v12 }
 0x120   :  { %v368_v13 = vpop.eup %367 }
 0x121   :  { %v130_v14 = vadd.f32 1.0, %v368_v13 }
 0x123   :  { %v131_v15 = vmul.f32 %v130_v14, %v130_v14 }
 0x125   :  { %v133_v16 = vadd.f32 1.0, %v131_v15  ;;  %v314_v17 = vadd.f32 -1.0, %v131_v15 }
 0x127   :  { %369 = vrcp.f32 %v133_v16 }
 0x131   :  { %v370_v18 = vpop.eup %369 }
 0x132   :  { %v135_v19 = vmul.f32 %v370_v18, %v314_v17 }
 0x134   :  { %v137_v20 = vmul.f32 %v135_v19, %v122_v7 }
 0x136   :  { %v138_v21 = vsel %vm136_vm2, %v122_v7, %v137_v20 }
 0x137   :  { %v139_v22 = vmin.f32 %v138_v21, 6.0 }
 0x139   :  { %v140_v23 = vpack.c.bf16 %v139_v22, %v139_v22 }
 0x13b   :  { %343 = vmatmul.mubr.msk.bf16.vlgmr.msra.gmra.mrb[0].mxu1 %vm164_vm3, %v140_v23 }
 0x20e   :  { %v202_v27 = vpop.f32.mrb[0].mxu1 }
 0x20f   :  { %v203_v28 = vadd.f32 %v315_v26, %v202_v27  ;;  %v344_v29 = vpop.f32.mrb[1].mxu1 }
 0x210   :  { %v205_v30 = vpop.f32.mrb[2].mxu1 }
 0x211   :  { %v208_v31 = vmin.f32 %v203_v28, 20.0  ;;  %v345_v32 = vpop.f32.mrb[3].mxu1  ;;  %vm217_vm4 = vcmp.gt.f32.partialorder %v203_v28, 20.0 }
 0x213   :  { %v209_v33 = vmul.f32 1.442695, %v208_v31 }
 0x215   :  { %371 = vpow2.f32 %v209_v33 }
 0x21f   :  { %v372_v34 = vpop.eup %371 }
 0x220   :  { %v211_v35 = vadd.f32 1.0, %v372_v34 }
 0x222   :  { %v212_v36 = vmul.f32 %v211_v35, %v211_v35 }
 0x224   :  { %v214_v37 = vadd.f32 1.0, %v212_v36  ;;  %v319_v38 = vadd.f32 -1.0, %v212_v36 }
 0x226   :  { %373 = vrcp.f32 %v214_v37 }
 0x230   :  { %v374_v39 = vpop.eup %373 }
 0x231   :  { %v216_v40 = vmul.f32 %v374_v39, %v319_v38 }
 0x233   :  { %v218_v41 = vmul.f32 %v216_v40, %v203_v28 }
 0x235   :  { %v219_v42 = vsel %vm217_vm4, %v203_v28, %v218_v41 }
 0x236   :  { %v220_v43 = vmin.f32 %v219_v42, 6.0 }
 0x238   :  { %v221_v44 = vpack.c.bf16 %v220_v43, %v220_v43 }
 0x23a   :  { %351 = vmatmul.mubr.msk.bf16.vlgmr.msra.gmra.mrb[4].mxu0 %vm164_vm3, %v221_v44 }
 0x30d   :  { %v282_v47 = vpop.f32.mrb[4].mxu0 }
 0x30e   :  { %v283_v49 = vadd.f32 %v320_v46, %v282_v47  ;;  %v352_v50 = vpop.f32.mrb[5].mxu0 }
 0x30f   :  { %v285_v51 = vpop.f32.mrb[6].mxu0 }
 0x310   :  { %v290_v52 = vmax.f32 %v283_v49, -10.0  ;;  %v353_v53 = vpop.f32.mrb[7].mxu0 }
 0x312   :  { %v291_v54 = vmin.f32 %v290_v52, 2.0 }
 0x314   :  { %v293_v55 = vsel %vm292_vm5, %v291_v54, %v283_v49 }
 0x315   :  { %294 = vst [vmem:[#allocation8] sm:$0xff] %v293_v55 }
 0x316   :  { %452 = shalt.err (!%p449_p0)
}
 0x317   :  { %s453_s24 = scalar_lea.hbm %s595_s7, 128 }
 0x318   :  { %p454_p1 = scmp.ne.s32.totalorder %s595_s7, %s453_s24  ;;  %p457_p2 = scmp.lt.u32.totalorder %s453_s24, %s595_s7 }
 0x31a   :  { %p459_p3 = pnand %p457_p2, %p454_p1 }
 0x31c   :  { %462 = shalt.err (!%p459_p3)
}
 0x31d   :  { %304 = dma.vmem_to_hbm [thread:$0]  %s302_s21, 128, %s595_s7, [#allocation4]  }
 0x31e   :  { %467 = dma.done.wait [#allocation4], 128  }
 0x31f   :  { %468 = vsyncadd [#allocation4], 4294967168 }
 0x320   :  { %308 = vsyncpa [#allocation3], 1 }
 0x321   :  { %309 = vsyncpa [#allocation6], 1 }
 0x322   :  { %310 = vsyncpa [#allocation4], 1 }

</bundles_post_ra>
